<compile_context>
chip_gen: v6e
topology: v6e:2x2x1
jax: 0.10.0
libtpu: 0.0.40
codegen_flags: <defaults>
</compile_context>

<pallas_src>
import functools

import jax
import jax.numpy as jnp
from jax.experimental import pallas as pl
from jax.experimental.pallas import tpu as pltpu


def _vmem_capacity_bytes() -> int:
    """Physical per-core VMEM; conservative fallback (v7x = 64 MiB)."""
    try:
        return int(pltpu.get_tpu_info().vmem_capacity_bytes)
    except Exception:
        return 64 << 20


def _soft_ce_kernel(logits_ref, target_ref, out_ref, acc_ref, *,
                    n_rows, block_n, tiles_per_group):
    c = pl.program_id(0)          # core group ("parallel", v7x: one per TC)
    i = pl.program_id(1)          # batch tile within group ("arbitrary")

    @pl.when(i == 0)
    def _init():
        acc_ref[...] = jnp.zeros_like(acc_ref)

    x = logits_ref[...].astype(jnp.float32)   # (block_n, C)
    t = target_ref[...].astype(jnp.float32)   # (block_n, C)

    # Numerically-stable logsumexp pieces over the class (lane) axis.
    m = jnp.max(x, axis=1, keepdims=True)                            # (bn, 1)
    lse = jnp.log(jnp.sum(jnp.exp(x - m), axis=1, keepdims=True))    # (bn, 1)
    sum_t = jnp.sum(t, axis=1, keepdims=True)                        # (bn, 1)
    sum_tx = jnp.sum(t * x, axis=1, keepdims=True)                   # (bn, 1)

    # -sum(t * log_softmax(x)) == (m + lse) * sum(t) - sum(t * x)
    per_row = (m + lse) * sum_t - sum_tx                             # (bn, 1)

    # Mask ragged-tail / duplicated (clamped) rows with a select (NOT a
    # multiply) so garbage rows (possibly NaN/Inf) contribute exactly 0.
    tile = c * tiles_per_group + i
    row_ids = tile * block_n + jax.lax.broadcasted_iota(jnp.int32, per_row.shape, 0)
    per_row = jnp.where(row_ids < n_rows, per_row, 0.0)

    # Lane/sublane-aligned running vector; no cross-sublane reduce per step.
    acc_ref[...] += per_row

    @pl.when(i == pl.num_programs(1) - 1)
    def _finalize():
        out_ref[...] = jnp.broadcast_to(jnp.sum(acc_ref[...]), out_ref.shape)


def soft_cross_entropy(logits: jax.Array, target: jax.Array, *, block_n=None) -> jax.Array:
    """logits, target: (N, C). Returns scalar f32 loss (mean over batch)."""
    assert logits.shape == target.shape and logits.ndim == 2
    N, C = logits.shape
    in_item = jnp.dtype(logits.dtype).itemsize
    C_acct = ((C + 127) // 128) * 128   # lane-padded width (VMEM accounting only)

    vmem_cap = _vmem_capacity_bytes()
    vmem_limit = int(min(vmem_cap * 85 // 100, 112 << 20))
    budget = vmem_limit * 85 // 100     # headroom for outputs / internal scratch

    if block_n is None:
        # Per batch-row VMEM cost: 2 inputs x 2 pipeline buffers in the input
        # dtype + ~4 f32 (block_n, C) temporaries + (block_n, 1) f32 acc.
        row_bytes = C_acct * (2 * 2 * in_item + 4 * 4) + 128 * 4
        block_n = budget // row_bytes
        block_n = min(block_n, 4096)    # cap (bn,1) stat-vector vreg/VMEM bloat

    block_n = int(block_n)
    if block_n >= N:
        block_n = N                     # single full-dim tile (divisibility waived)
    else:
        block_n = max((block_n // 8) * 8, 8)

    num_tiles = -(-N // block_n)
    groups = 2 if num_tiles >= 2 else 1           # v7x: one group per TensorCore
    tiles_per_group = -(-num_tiles // groups)

    def in_map(c, i):
        # Clamp so the DMA never reads past the last real tile; duplicated /
        # ragged rows are masked inside the kernel by global row index.
        return (jnp.minimum(c * tiles_per_group + i, num_tiles - 1), 0)

    cost = pl.CostEstimate(
        flops=int(6 * N * C),
        transcendentals=int(N * C + N),
        bytes_accessed=int(2 * N * C * in_item + groups * 8 * 128 * 4),
    )

    kernel = functools.partial(_soft_ce_kernel, n_rows=N, block_n=block_n,
                               tiles_per_group=tiles_per_group)
    out = pl.pallas_call(
        kernel,
        out_shape=jax.ShapeDtypeStruct((groups, 8, 128), jnp.float32),
        grid=(groups, tiles_per_group),
        in_specs=[
            pl.BlockSpec((block_n, C), in_map),
            pl.BlockSpec((block_n, C), in_map),
        ],
        out_specs=pl.BlockSpec((1, 8, 128), lambda c, i: (c, 0, 0)),
        scratch_shapes=[pltpu.VMEM((block_n, 1), jnp.float32)],
        compiler_params=pltpu.CompilerParams(
            dimension_semantics=("parallel", "arbitrary"),
            vmem_limit_bytes=int(vmem_limit),
        ),
        cost_estimate=cost,
    )(logits, target)

    # Each group's partial sits (replicated) in its (8,128) slab; take [0,0].
    return jnp.sum(out[:, 0, 0]) / jnp.float32(N)


def soft_cross_entropy_ref(logits, target):
    # Pure-JAX reference mirroring the PyTorch module.
    logp = jax.nn.log_softmax(logits.astype(jnp.float32), axis=1)
    return jnp.mean(jnp.sum(-target.astype(jnp.float32) * logp, axis=1))


if __name__ == "__main__":
    key = jax.random.PRNGKey(0)
    k1, k2, k3, k4, k5, k6 = jax.random.split(key, 6)

    # Small shapes consistent with the module: batch of 8 examples, 32 classes.
    N, C = 8, 32
    logits = jax.random.normal(k1, (N, C), dtype=jnp.float32)
    target = jax.nn.softmax(jax.random.normal(k2, (N, C), dtype=jnp.float32), axis=1)
    loss = soft_cross_entropy(logits, target)
    jax.block_until_ready(loss)
    ref = soft_cross_entropy_ref(logits, target)
    assert jnp.allclose(loss, ref, atol=1e-5, rtol=1e-4), (loss, ref)

    # Tiled + ragged path: 3 real tiles, 2 parallel groups (one clamped+masked
    # duplicate tile), ragged last batch tile, C not a multiple of 128.
    N2, C2 = 20, 200
    logits2 = jax.random.normal(k3, (N2, C2), dtype=jnp.float32)
    target2 = jax.nn.softmax(jax.random.normal(k4, (N2, C2), dtype=jnp.float32), axis=1)
    loss2 = soft_cross_entropy(logits2, target2, block_n=8)
    jax.block_until_ready(loss2)
    ref2 = soft_cross_entropy_ref(logits2, target2)
    assert jnp.allclose(loss2, ref2, atol=1e-5, rtol=1e-4), (loss2, ref2)

    # bf16 inputs + auto block sizing (exercises the VMEM-aware sizing path).
    N3, C3 = 300, 1000
    logits3 = jax.random.normal(k5, (N3, C3), dtype=jnp.float32).astype(jnp.bfloat16)
    target3 = jax.nn.softmax(jax.random.normal(k6, (N3, C3), dtype=jnp.float32),
                             axis=1).astype(jnp.bfloat16)
    loss3 = soft_cross_entropy(logits3, target3)
    jax.block_until_ready(loss3)
    ref3 = soft_cross_entropy_ref(logits3, target3)
    assert jnp.allclose(loss3, ref3, atol=5e-3, rtol=1e-3), (loss3, ref3)

    print("KERNEL_OK")
</pallas_src>

<mosaic_0001>
module attributes {stable_mosaic.version = 11 : i64} {
  func.func @_soft_ce_kernel(%arg0: i32, %arg1: i32, %arg2: memref<8x32xf32, #tpu.memory_space<vmem>>, %arg3: memref<8x32xf32, #tpu.memory_space<vmem>>, %arg4: memref<1x8x128xf32, #tpu.memory_space<vmem>>, %arg5: memref<8x1xf32, #tpu.memory_space<vmem>>) attributes {dimension_semantics = [#tpu.dimension_semantics<parallel>, #tpu.dimension_semantics<arbitrary>], iteration_bounds = array<i64: 1, 1>, scalar_prefetch = 0 : i64, scratch_operands = 1 : i64, tpu.core_type = #tpu.core_type<tc>, window_params = [{transform_indices = @transform_0, window_bounds = array<i64: 8, 32>}, {transform_indices = @transform_1, window_bounds = array<i64: 8, 32>}, {transform_indices = @transform_2, window_bounds = array<i64: 1, 8, 128>}]} {
    %c0_i32 = arith.constant 0 : i32
    %0 = arith.cmpi eq, %arg1, %c0_i32 : i32
    %1 = arith.extui %0 : i1 to i32
    %c0_i32_0 = arith.constant 0 : i32
    %2 = arith.cmpi ne, %1, %c0_i32_0 : i32
    scf.if %2 {
      %cst_15 = arith.constant 0.000000e+00 : f32
      %37 = vector.broadcast %cst_15 : f32 to vector<8x1xf32>
      %c0_16 = arith.constant 0 : index
      %c0_17 = arith.constant 0 : index
      %38 = vector.load %arg5[%c0_16, %c0_17] : memref<8x1xf32, #tpu.memory_space<vmem>>, vector<8x1xf32>
      tpu.vector_store %arg5[%c0_16, %c0_17], %37 {strides = array<i32>} : memref<8x1xf32, #tpu.memory_space<vmem>>, vector<8x1xf32>,
    } else {
    }
    %c0 = arith.constant 0 : index
    %c0_1 = arith.constant 0 : index
    %3 = vector.load %arg2[%c0, %c0_1] : memref<8x32xf32, #tpu.memory_space<vmem>>, vector<8x32xf32>
    %c0_2 = arith.constant 0 : index
    %c0_3 = arith.constant 0 : index
    %4 = vector.load %arg3[%c0_2, %c0_3] : memref<8x32xf32, #tpu.memory_space<vmem>>, vector<8x32xf32>
    %cst = arith.constant dense<0xFF800000> : vector<8xf32>
    %5 = vector.multi_reduction <maximumf>, %3, %cst [1] : vector<8x32xf32> to vector<8xf32>
    %6 = vector.shape_cast %5 : vector<8xf32> to vector<8x1xf32>
    %7 = vector.broadcast %6 : vector<8x1xf32> to vector<8x32xf32>
    %8 = arith.subf %3, %7 : vector<8x32xf32>
    %9 = math.exp %8 : vector<8x32xf32>
    %cst_4 = arith.constant dense<0.000000e+00> : vector<8xf32>
    %10 = vector.multi_reduction <add>, %9, %cst_4 [1] : vector<8x32xf32> to vector<8xf32>
    %11 = vector.shape_cast %10 : vector<8xf32> to vector<8x1xf32>
    %12 = math.log %11 : vector<8x1xf32>
    %cst_5 = arith.constant dense<0.000000e+00> : vector<8xf32>
    %13 = vector.multi_reduction <add>, %4, %cst_5 [1] : vector<8x32xf32> to vector<8xf32>
    %14 = vector.shape_cast %13 : vector<8xf32> to vector<8x1xf32>
    %15 = arith.mulf %4, %3 : vector<8x32xf32>
    %cst_6 = arith.constant dense<0.000000e+00> : vector<8xf32>
    %16 = vector.multi_reduction <add>, %15, %cst_6 [1] : vector<8x32xf32> to vector<8xf32>
    %17 = vector.shape_cast %16 : vector<8xf32> to vector<8x1xf32>
    %18 = arith.addf %6, %12 : vector<8x1xf32>
    %19 = arith.mulf %18, %14 : vector<8x1xf32>
    %20 = arith.subf %19, %17 : vector<8x1xf32>
    %c1_i32 = arith.constant 1 : i32
    %21 = arith.muli %arg0, %c1_i32 : i32
    %22 = arith.addi %21, %arg1 : i32
    %c8_i32 = arith.constant 8 : i32
    %23 = arith.muli %22, %c8_i32 : i32
    %24 = tpu.iota {dimensions = array<i32: 0>} : vector<8x1xi32>
    %25 = vector.broadcast %23 : i32 to vector<8x1xi32>
    %26 = arith.addi %25, %24 : vector<8x1xi32>
    %c8_i32_7 = arith.constant 8 : i32
    %27 = vector.broadcast %c8_i32_7 : i32 to vector<8x1xi32>
    %28 = arith.cmpi slt, %26, %27 : vector<8x1xi32>
    %cst_8 = arith.constant 0.000000e+00 : f32
    %29 = vector.broadcast %cst_8 : f32 to vector<8x1xf32>
    %30 = arith.select %28, %20, %29 : vector<8x1xi1>, vector<8x1xf32>
    %c0_9 = arith.constant 0 : index
    %c0_10 = arith.constant 0 : index
    %31 = vector.load %arg5[%c0_9, %c0_10] : memref<8x1xf32, #tpu.memory_space<vmem>>, vector<8x1xf32>
    %32 = arith.addf %31, %30 : vector<8x1xf32>
    %c0_11 = arith.constant 0 : index
    %c0_12 = arith.constant 0 : index
    %33 = vector.load %arg5[%c0_11, %c0_12] : memref<8x1xf32, #tpu.memory_space<vmem>>, vector<8x1xf32>
    tpu.vector_store %arg5[%c0_11, %c0_12], %32 {strides = array<i32>} : memref<8x1xf32, #tpu.memory_space<vmem>>, vector<8x1xf32>,
    %c0_i32_13 = arith.constant 0 : i32
    %34 = arith.cmpi eq, %arg1, %c0_i32_13 : i32
    %35 = arith.extui %34 : i1 to i32
    %c0_i32_14 = arith.constant 0 : i32
    %36 = arith.cmpi ne, %35, %c0_i32_14 : i32
    scf.if %36 {
      %c0_15 = arith.constant 0 : index
      %c0_16 = arith.constant 0 : index
      %37 = vector.load %arg5[%c0_15, %c0_16] : memref<8x1xf32, #tpu.memory_space<vmem>>, vector<8x1xf32>
      %38 = vector.shape_cast %37 : vector<8x1xf32> to vector<1x8x1xf32>
      %cst_17 = arith.constant dense<0.000000e+00> : vector<1xf32>
      %39 = vector.multi_reduction <add>, %38, %cst_17 [1, 2] : vector<1x8x1xf32> to vector<1xf32>
      %40 = vector.shape_cast %39 : vector<1xf32> to vector<1x1x1xf32>
      %41 = vector.extract %40[0, 0, 0] : f32 from vector<1x1x1xf32>
      %42 = vector.broadcast %41 : f32 to vector<1x8x128xf32>
      %c0_18 = arith.constant 0 : index
      %c0_19 = arith.constant 0 : index
      %c0_20 = arith.constant 0 : index
      %43 = vector.load %arg4[%c0_18, %c0_19, %c0_20] : memref<1x8x128xf32, #tpu.memory_space<vmem>>, vector<1x8x128xf32>
      tpu.vector_store %arg4[%c0_18, %c0_19, %c0_20], %42 {strides = array<i32>} : memref<1x8x128xf32, #tpu.memory_space<vmem>>, vector<1x8x128xf32>,
    } else {
    }
    return
  }
  func.func @transform_0(%arg0: i32, %arg1: i32) -> (i32, i32) {
    %c1_i32 = arith.constant 1 : i32
    %0 = arith.muli %arg0, %c1_i32 : i32
    %1 = arith.addi %0, %arg1 : i32
    %c0_i32 = arith.constant 0 : i32
    %2 = arith.minsi %1, %c0_i32 : i32
    %c0_i32_0 = arith.constant 0 : i32
    %c0_i32_1 = arith.constant 0 : i32
    return %2, %c0_i32_0 : i32, i32
  }
  func.func @transform_1(%arg0: i32, %arg1: i32) -> (i32, i32) {
    %c1_i32 = arith.constant 1 : i32
    %0 = arith.muli %arg0, %c1_i32 : i32
    %1 = arith.addi %0, %arg1 : i32
    %c0_i32 = arith.constant 0 : i32
    %2 = arith.minsi %1, %c0_i32 : i32
    %c0_i32_0 = arith.constant 0 : i32
    %c0_i32_1 = arith.constant 0 : i32
    return %2, %c0_i32_0 : i32, i32
  }
  func.func @transform_2(%arg0: i32, %arg1: i32) -> (i32, i32, i32) {
    %c0_i32 = arith.constant 0 : i32
    %c0_i32_0 = arith.constant 0 : i32
    %c0_i32_1 = arith.constant 0 : i32
    return %arg0, %c0_i32, %c0_i32_0 : i32, i32, i32
  }
}

</mosaic_0001>

<bundles_post_ra>
// kernel: tpu_custom_call.1
= control target key start
LH: loop header
LB: loop body
LE: loop exit
PB: predicated region body
PF: predicated region fallthrough
CT: control target
= control target key end

     0   :  { %7 = vsyncpa [#allocation4], 0  ;;  %s237_s0 = inlined_call_operand.hbm [shape: f32[8,32], index: 0, kind: input, shape index: {}]   ;;  %s238_s1 = inlined_call_operand.hbm [shape: f32[8,32], index: 1, kind: input, shape index: {}]   ;;  %s239_s2 = inlined_call_operand.hbm [shape: f32[1,8,128], index: 2, kind: output, shape index: {}]  }
   0x1   :  { %8 = vsyncpa [#allocation7], 0 }
   0x2   :  { %9 = vsyncpa [#allocation5], 0  ;;  %s206_s9 = smov [#allocation3]   ;;  %s207_s11 = smov [#allocation6]  }
   0x3   :  { %s21_s10 = sshll.u32 %s206_s9, 4  ;;  %s36_s12 = sshll.u32 %s207_s11, 4  ;;  %s22_s10 = int_to_ptr.vmem [resolvable:$true] %s21_s10  ;;  %s37_s12 = int_to_ptr.vmem [resolvable:$true] %s36_s12 }
   0x4   :  { %s148_s13 = scalar_lea.vmem %s22_s10, 128  ;;  %p153_p1 = scmp.lt.s32.totalorder %s22_s10, %s22_s10 }
   0x5   :  { %p149_p0 = scmp.ne.s32.totalorder %s22_s10, %s148_s13  ;;  %p154_p2 = scmp.lt.s32.totalorder %s148_s13, %s148_s13 }
   0x7   :  { %p155_p3 = por %p154_p2, %p153_p1 }
   0x9   :  { %p156_p4 = pnand %p155_p3, %p149_p0 }
   0xb   :  { %159 = shalt.err (!%p156_p4)
}
   0xc   :  { %24 = dma.hbm_to_vmem [thread:$0]  %s237_s0, 128, %s22_s10, [#allocation4]  }
   0xd   :  { %s168_s16 = scalar_lea.vmem %s37_s12, 128  ;;  %p173_p6 = scmp.lt.s32.totalorder %s37_s12, %s37_s12 }
   0xe   :  { %p169_p5 = scmp.ne.s32.totalorder %s37_s12, %s168_s16  ;;  %p174_p7 = scmp.lt.s32.totalorder %s168_s16, %s168_s16 }
  0x10   :  { %p175_p8 = por %p174_p7, %p173_p6 }
  0x12   :  { %p176_p9 = pnand %p175_p8, %p169_p5 }
  0x14   :  { %179 = shalt.err (!%p176_p9)
}
  0x15   :  { %39 = dma.hbm_to_vmem [thread:$0]  %s238_s1, 128, %s37_s12, [#allocation7]  }
  0x16   :  { %200 = dma.done.wait [#allocation4], 128  }
  0x17   :  { %201 = vsyncadd [#allocation4], 4294967168 }
  0x18   :  { %202 = dma.done.wait [#allocation7], 128  }
  0x19   :  { %203 = vsyncadd [#allocation7], 4294967168  ;;  %vm60_vm0 = vcmask 261120   ;;  %v58_v0 = vld [vmem:[#allocation3] sm:$0xff]  ;;  %v59_v2 = vld [vmem:[#allocation6] sm:$0xff]  ;;  %vm56_vm1 = vcmask 7168  }
  0x1a   :  { %v61_v1 = vsel %vm60_vm0, %v58_v0, -inf  ;;  %v72_v3 = vsel %vm60_vm0, %v59_v2, 0.0  ;;  %v75_v4 = vmul.f32 %v59_v2, %v58_v0  ;;  %v208_v11 = vmov 0.0   ;;  %s209_s0 = smov [#allocation8]  }
  0x1b   :  { %62 = vmax.xlane.f32.xlu0 %v61_v1  ;;  %73 = vadd.xlane.f32.xlu1 %v72_v3  ;;  %57 = vst.msk [vmem:[#allocation2] sm:$0xff] %vm56_vm1, %v208_v11  ;;  %s116_s1 = sshll.u32 %s209_s0, 4  ;;  %s117_s1 = int_to_ptr.vmem [resolvable:$true] %s116_s1 }
  0x1c   :  { %v76_v5 = vsel %vm60_vm0, %v75_v4, 0.0  ;;  %s180_s20 = scalar_lea.vmem %s117_s1, 128  ;;  %p185_p11 = scmp.lt.s32.totalorder %s117_s1, %s117_s1 }
  0x1d   :  { %p181_p10 = scmp.ne.s32.totalorder %s117_s1, %s180_s20  ;;  %p186_p12 = scmp.lt.s32.totalorder %s180_s20, %s180_s20 }
  0x1f   :  { %77 = vadd.xlane.f32.xlu1 %v76_v5  ;;  %p187_p13 = por %p186_p12, %p185_p11 }
  0x21   :  { %p188_p0 = pnand %p187_p13, %p181_p10 }
  0x22   :  { %v90_v19 = vld [vmem:[#allocation2] sm:$0xff] }
  0xa4   :  { %v63_v6 = vpop.xlane.xlu0 %62  ;;  %v74_v13 = vpop.xlane.xlu1 %73 }
  0xa5   :  { %v64_v7 = vsub.f32 %v58_v0, %v63_v6 }
  0xa7   :  { %v65_v8 = vmul.f32 1.442695, %v64_v7 }
  0xa8   :  { %v78_v17 = vpop.xlane.xlu1 %77 }
  0xa9   :  { %136 = vpow2.f32 %v65_v8 }
  0xb6   :  { %v137_v9 = vpop.eup %136 }
  0xb7   :  { %v67_v10 = vsel %vm60_vm0, %v137_v9, 0.0 }
  0xb8   :  { %68 = vadd.xlane.f32.xlu0 %v67_v10 }
 0x141   :  { %v69_v12 = vpop.xlane.xlu0 %68 }
 0x142   :  { %138 = vlog2.f32 %v69_v12 }
 0x14f   :  { %v139_v14 = vpop.eup %138 }
 0x150   :  { %v71_v15 = vmul.f32 0.6931472, %v139_v14 }
 0x152   :  { %v79_v16 = vadd.f32 %v71_v15, %v63_v6 }
 0x154   :  { %v80_v18 = vmul.f32 %v79_v16, %v74_v13 }
 0x156   :  { %v81_v20 = vsub.f32 %v80_v18, %v78_v17 }
 0x158   :  { %v91_v21 = vadd.f32 %v90_v19, %v81_v20 }
 0x15a   :  { %93 = vst.msk [vmem:[#allocation2] sm:$0xff] %vm56_vm1, %v91_v21 }
 0x161   :  { %v97_v22 = vld [vmem:[#allocation2] sm:$0xff] }
 0x162   :  { %v98_v23 = vsel %vm56_vm1, %v97_v22, 0.0 }
 0x163   :  { %99 = vadd.xlane.f32.xlu0 %v98_v23 }
 0x1ec   :  { %v100_v24 = vpop.xlane.xlu0 %99 }
 0x1ed   :  { %v101_v25 = vrot.slane %v100_v24, 4 }
 0x1ef   :  { %v102_v26 = vadd.f32 %v101_v25, %v100_v24 }
 0x1f1   :  { %v103_v27 = vrot.slane %v102_v26, 2 }
 0x1f3   :  { %v104_v28 = vadd.f32 %v103_v27, %v102_v26 }
 0x1f5   :  { %v105_v29 = vrot.slane %v104_v28, 1 }
 0x1f7   :  { %v106_v30 = vadd.f32 %v105_v29, %v104_v28 }
 0x1f9   :  { %130 = vpush %v106_v30 }
 0x22a   :  { %s131_s19 = spop %130 }
 0x22b   :  { %v108_v31 = vstv %s131_s19 }
 0x22c   :  { %109 = vst [vmem:[#allocation8] sm:$0xff] %v108_v31 }
 0x22d   :  { %191 = shalt.err (!%p188_p0)
}
 0x22e   :  { %119 = dma.vmem_to_hbm [thread:$0]  %s117_s1, 128, %s239_s2, [#allocation5]  }
 0x22f   :  { %204 = dma.done.wait [#allocation5], 128  }
 0x230   :  { %205 = vsyncadd [#allocation5], 4294967168 }
 0x231   :  { %123 = vsyncpa [#allocation4], 1 }
 0x232   :  { %124 = vsyncpa [#allocation7], 1 }
 0x233   :  { %125 = vsyncpa [#allocation5], 1 }

</bundles_post_ra>
